<compile_context>
chip_gen: v6e
topology: v6e:2x2x1
jax: 0.10.0
libtpu: 0.0.40
codegen_flags: <defaults>
</compile_context>

<pallas_src>
import jax
import jax.numpy as jnp
from jax.experimental import pallas as pl
from jax.experimental.pallas import tpu as pltpu


# ---------------------------------------------------------------------------
# Pallas kernel: fused 2-layer MLP for one batch tile.
#   hidden = relu(x @ W1 + b1)      logits = hidden @ W2 + b2
# Weights/biases see the same (0,0) block every grid step -> stay resident in
# VMEM; only the x tile and the two output tiles stream through the pipeline.
# Biases arrive already in f32; the epilogue is f32 and only casts at stores.
# ---------------------------------------------------------------------------
def _mlp_kernel(x_ref, w1_ref, b1_ref, w2_ref, b2_ref, h_ref, y_ref):
    # First matmul, f32 accumulate on the MXU.
    h = jnp.dot(x_ref[...], w1_ref[...], preferred_element_type=jnp.float32)
    h = jnp.maximum(h + b1_ref[...], 0.0)          # f32 epilogue (v5e-safe)
    # Store hidden once per tile; feed the *stored* (cast) value into the
    # second matmul so (hidden, logits) stay consistent for bf16 outputs.
    h_out = h.astype(h_ref.dtype)
    h_ref[...] = h_out
    y = jnp.dot(h_out, w2_ref[...], preferred_element_type=jnp.float32)
    y_ref[...] = (y + b2_ref[...]).astype(y_ref.dtype)


def _choose_batch_tile(B, max_tb):
    """Pick a batch tile that avoids any host-side pad/slice when possible."""
    if B <= max_tb:
        return B, 0                      # single tile == full batch, no pad
    # Largest multiple-of-8 divisor of B not exceeding max_tb (exact grid).
    tb = max_tb - (max_tb % 8)
    while tb >= 8:
        if B % tb == 0:
            return tb, 0
        tb -= 8
    # Fallback: ragged batch -> pad up to a multiple of max_tb.
    # TODO(synk): handle the ragged last tile with an in-kernel masked store
    # instead of this host-side pad/slice fallback.
    Bp = pl.cdiv(B, max_tb) * max_tb
    return max_tb, Bp - B


def fused_mlp(x, w1, b1, w2, b2, *, max_tb=512, mxu_dtype=None):
    """Fused MLP. x: [B, D], w1: [D, H], b1: [1|H, H], w2: [H, O], b2: [1|O, O].

    mxu_dtype: optional dtype (e.g. jnp.bfloat16) for the MXU operands
    (x, w1, w2, stored hidden).  Accumulation and the bias/ReLU epilogue stay
    f32 regardless.
    """
    B, D = x.shape
    H = w1.shape[1]
    O = w2.shape[1]
    assert D % 128 == 0 and H % 128 == 0 and O % 128 == 0, (
        "feature dims must be lane-dense (multiples of 128)")

    if mxu_dtype is not None:
        x = x.astype(mxu_dtype)
        w1 = w1.astype(mxu_dtype)
        w2 = w2.astype(mxu_dtype)
    out_dtype = x.dtype

    # Hoist the bias casts out of the kernel body (done once, on the host).
    b1f = b1.astype(jnp.float32).reshape(1, H)
    b2f = b2.astype(jnp.float32).reshape(1, O)

    tb, pad = _choose_batch_tile(B, max_tb)
    if pad:
        x = jnp.pad(x, ((0, pad), (0, 0)))
    Bp = B + pad
    n_tiles = Bp // tb

    act_bytes = jnp.dtype(out_dtype).itemsize
    cost = pl.CostEstimate(
        flops=2 * Bp * (D * H + H * O),
        transcendentals=0,
        bytes_accessed=(
            Bp * D * act_bytes                       # x in
            + D * H * jnp.dtype(w1.dtype).itemsize   # w1
            + H * O * jnp.dtype(w2.dtype).itemsize   # w2
            + (H + O) * 4                            # f32 biases
            + Bp * H * act_bytes                     # hidden out
            + Bp * O * act_bytes),                   # logits out
    )

    hidden, logits = pl.pallas_call(
        _mlp_kernel,
        out_shape=(
            jax.ShapeDtypeStruct((Bp, H), out_dtype),
            jax.ShapeDtypeStruct((Bp, O), out_dtype),
        ),
        grid=(n_tiles,),
        in_specs=[
            pl.BlockSpec((tb, D), lambda i: (i, 0)),   # streamed per batch tile
            pl.BlockSpec((D, H), lambda i: (0, 0)),    # VMEM-resident weights
            pl.BlockSpec((1, H), lambda i: (0, 0)),    # VMEM-resident f32 bias
            pl.BlockSpec((H, O), lambda i: (0, 0)),
            pl.BlockSpec((1, O), lambda i: (0, 0)),
        ],
        out_specs=(
            pl.BlockSpec((tb, H), lambda i: (i, 0)),
            pl.BlockSpec((tb, O), lambda i: (i, 0)),
        ),
        compiler_params=pltpu.CompilerParams(
            dimension_semantics=("parallel",),          # megacore-shardable on v7x
        ),
        cost_estimate=cost,
    )(x, w1, b1f, w2, b2f)

    if pad:
        hidden = hidden[:B]
        logits = logits[:B]
    return hidden, logits


# ---------------------------------------------------------------------------
# Synthetic inner model (the `model` being wrapped). Returns a dict so the
# wrapper's dict -> list(values()) branch is exercised.
# ---------------------------------------------------------------------------
class InnerMLPModel:
    def __init__(self, key, in_features=128, hidden_features=256,
                 out_features=128, dtype=jnp.float32):
        k1, k2, k3, k4 = jax.random.split(key, 4)
        self.w1 = (jax.random.normal(k1, (in_features, hidden_features), dtype)
                   * (1.0 / jnp.sqrt(in_features)))
        self.b1 = jax.random.normal(k2, (1, hidden_features), dtype) * 0.01
        self.w2 = (jax.random.normal(k3, (hidden_features, out_features), dtype)
                   * (1.0 / jnp.sqrt(hidden_features)))
        self.b2 = jax.random.normal(k4, (1, out_features), dtype) * 0.01

    def __call__(self, x):
        hidden, logits = fused_mlp(x, self.w1, self.b1, self.w2, self.b2)
        return {"hidden": hidden, "logits": logits}


# ---------------------------------------------------------------------------
# TraceModelWrapper — exact forward semantics of the PyTorch module.
# ---------------------------------------------------------------------------
class TraceModelWrapper:
    def __init__(self, model):
        self.model = model

    def __call__(self, *input_data, **input_dict):
        out = self.model(*input_data, **input_dict)
        if isinstance(out, dict):
            return list(out.values())
        return out


if __name__ == "__main__":
    key = jax.random.PRNGKey(0)
    k_params, k_x = jax.random.split(key)

    # Lane-dense / MXU-friendly sizes; batch=256 fits in ONE tile (no pad,
    # no slice, single grid step).
    batch, d_in, d_hidden, d_out = 256, 128, 256, 128
    inner = InnerMLPModel(k_params, in_features=d_in,
                          hidden_features=d_hidden, out_features=d_out)
    wrapper = TraceModelWrapper(inner)

    x = jax.random.normal(k_x, (batch, d_in), jnp.float32)

    outputs = wrapper(x)                      # list of dict values: [hidden, logits]
    outputs = [jax.block_until_ready(o) for o in outputs]

    # Correctness check vs. pure-JAX reference (highest-precision dots).
    h_ref = jnp.maximum(
        jnp.dot(x, inner.w1, precision=jax.lax.Precision.HIGHEST) + inner.b1, 0.0)
    y_ref = jnp.dot(h_ref, inner.w2, precision=jax.lax.Precision.HIGHEST) + inner.b2

    assert isinstance(outputs, list) and len(outputs) == 2
    assert outputs[0].shape == (batch, d_hidden)
    assert outputs[1].shape == (batch, d_out)
    assert jnp.allclose(outputs[0], h_ref, atol=1e-3, rtol=1e-3)
    assert jnp.allclose(outputs[1], y_ref, atol=1e-3, rtol=1e-3)

    # bf16 MXU-operand fast path (v6e/v7x): same kernel, looser tolerance
    # expected from bf16 operand rounding (accumulation stays f32).
    h_bf, y_bf = fused_mlp(x, inner.w1, inner.b1, inner.w2, inner.b2,
                           mxu_dtype=jnp.bfloat16)
    jax.block_until_ready(y_bf)
    assert h_bf.shape == (batch, d_hidden) and y_bf.shape == (batch, d_out)
    assert jnp.allclose(h_bf.astype(jnp.float32), h_ref, atol=5e-2, rtol=5e-2)
    assert jnp.allclose(y_bf.astype(jnp.float32), y_ref, atol=5e-2, rtol=5e-2)

    print("KERNEL_OK")
</pallas_src>

<mosaic_0001>
module attributes {stable_mosaic.version = 11 : i64} {
  func.func @_mlp_kernel(%arg0: i32, %arg1: memref<256x128xf32, #tpu.memory_space<vmem>>, %arg2: memref<128x256xf32, #tpu.memory_space<vmem>>, %arg3: memref<1x256xf32, #tpu.memory_space<vmem>>, %arg4: memref<256x128xf32, #tpu.memory_space<vmem>>, %arg5: memref<1x128xf32, #tpu.memory_space<vmem>>, %arg6: memref<256x256xf32, #tpu.memory_space<vmem>>, %arg7: memref<256x128xf32, #tpu.memory_space<vmem>>) attributes {dimension_semantics = [#tpu.dimension_semantics<parallel>], iteration_bounds = array<i64: 1>, scalar_prefetch = 0 : i64, scratch_operands = 0 : i64, tpu.core_type = #tpu.core_type<tc>, window_params = [{transform_indices = @transform_0, window_bounds = array<i64: 256, 128>}, {pipeline_mode = #tpu.pipeline_mode<synchronous>, transform_indices = @transform_1, window_bounds = array<i64: 128, 256>}, {pipeline_mode = #tpu.pipeline_mode<synchronous>, transform_indices = @transform_2, window_bounds = array<i64: 1, 256>}, {pipeline_mode = #tpu.pipeline_mode<synchronous>, transform_indices = @transform_3, window_bounds = array<i64: 256, 128>}, {pipeline_mode = #tpu.pipeline_mode<synchronous>, transform_indices = @transform_4, window_bounds = array<i64: 1, 128>}, {transform_indices = @transform_5, window_bounds = array<i64: 256, 256>}, {transform_indices = @transform_6, window_bounds = array<i64: 256, 128>}]} {
    %c0 = arith.constant 0 : index
    %c0_0 = arith.constant 0 : index
    %0 = vector.load %arg1[%c0, %c0_0] : memref<256x128xf32, #tpu.memory_space<vmem>>, vector<256x128xf32>
    %c0_1 = arith.constant 0 : index
    %c0_2 = arith.constant 0 : index
    %1 = vector.load %arg2[%c0_1, %c0_2] : memref<128x256xf32, #tpu.memory_space<vmem>>, vector<128x256xf32>
    %cst = arith.constant dense<0.000000e+00> : vector<256x256xf32>
    %2 = tpu.matmul %0, %1, %cst {dimension_numbers = #tpu.dot_dimension_numbers<[1], [0], [0], [1], [0, 0, 1, 1], [], []>} : vector<256x128xf32>, vector<128x256xf32>, vector<256x256xf32> -> vector<256x256xf32>
    %c0_3 = arith.constant 0 : index
    %c0_4 = arith.constant 0 : index
    %3 = vector.load %arg3[%c0_3, %c0_4] : memref<1x256xf32, #tpu.memory_space<vmem>>, vector<1x256xf32>
    %4 = vector.broadcast %3 : vector<1x256xf32> to vector<256x256xf32>
    %5 = arith.addf %2, %4 : vector<256x256xf32>
    %cst_5 = arith.constant 0.000000e+00 : f32
    %6 = vector.broadcast %cst_5 : f32 to vector<256x256xf32>
    %7 = arith.maximumf %5, %6 : vector<256x256xf32>
    %c0_6 = arith.constant 0 : index
    %c0_7 = arith.constant 0 : index
    %8 = vector.load %arg6[%c0_6, %c0_7] : memref<256x256xf32, #tpu.memory_space<vmem>>, vector<256x256xf32>
    tpu.vector_store %arg6[%c0_6, %c0_7], %7 {strides = array<i32>} : memref<256x256xf32, #tpu.memory_space<vmem>>, vector<256x256xf32>,
    %c0_8 = arith.constant 0 : index
    %c0_9 = arith.constant 0 : index
    %9 = vector.load %arg4[%c0_8, %c0_9] : memref<256x128xf32, #tpu.memory_space<vmem>>, vector<256x128xf32>
    %cst_10 = arith.constant dense<0.000000e+00> : vector<256x128xf32>
    %10 = tpu.matmul %7, %9, %cst_10 {dimension_numbers = #tpu.dot_dimension_numbers<[1], [0], [0], [1], [0, 0, 1, 1], [], []>} : vector<256x256xf32>, vector<256x128xf32>, vector<256x128xf32> -> vector<256x128xf32>
    %c0_11 = arith.constant 0 : index
    %c0_12 = arith.constant 0 : index
    %11 = vector.load %arg5[%c0_11, %c0_12] : memref<1x128xf32, #tpu.memory_space<vmem>>, vector<1x128xf32>
    %12 = vector.broadcast %11 : vector<1x128xf32> to vector<256x128xf32>
    %13 = arith.addf %10, %12 : vector<256x128xf32>
    %c0_13 = arith.constant 0 : index
    %c0_14 = arith.constant 0 : index
    %14 = vector.load %arg7[%c0_13, %c0_14] : memref<256x128xf32, #tpu.memory_space<vmem>>, vector<256x128xf32>
    tpu.vector_store %arg7[%c0_13, %c0_14], %13 {strides = array<i32>} : memref<256x128xf32, #tpu.memory_space<vmem>>, vector<256x128xf32>,
    return
  }
  func.func @transform_0(%arg0: i32) -> (i32, i32) {
    %c0_i32 = arith.constant 0 : i32
    %c0_i32_0 = arith.constant 0 : i32
    return %arg0, %c0_i32 : i32, i32
  }
  func.func @transform_1(%arg0: i32) -> (i32, i32) {
    %c0_i32 = arith.constant 0 : i32
    %c0_i32_0 = arith.constant 0 : i32
    %c0_i32_1 = arith.constant 0 : i32
    return %c0_i32, %c0_i32_0 : i32, i32
  }
  func.func @transform_2(%arg0: i32) -> (i32, i32) {
    %c0_i32 = arith.constant 0 : i32
    %c0_i32_0 = arith.constant 0 : i32
    %c0_i32_1 = arith.constant 0 : i32
    return %c0_i32, %c0_i32_0 : i32, i32
  }
  func.func @transform_3(%arg0: i32) -> (i32, i32) {
    %c0_i32 = arith.constant 0 : i32
    %c0_i32_0 = arith.constant 0 : i32
    %c0_i32_1 = arith.constant 0 : i32
    return %c0_i32, %c0_i32_0 : i32, i32
  }
  func.func @transform_4(%arg0: i32) -> (i32, i32) {
    %c0_i32 = arith.constant 0 : i32
    %c0_i32_0 = arith.constant 0 : i32
    %c0_i32_1 = arith.constant 0 : i32
    return %c0_i32, %c0_i32_0 : i32, i32
  }
  func.func @transform_5(%arg0: i32) -> (i32, i32) {
    %c0_i32 = arith.constant 0 : i32
    %c0_i32_0 = arith.constant 0 : i32
    return %arg0, %c0_i32 : i32, i32
  }
  func.func @transform_6(%arg0: i32) -> (i32, i32) {
    %c0_i32 = arith.constant 0 : i32
    %c0_i32_0 = arith.constant 0 : i32
    return %arg0, %c0_i32 : i32, i32
  }
}

</mosaic_0001>

<bundles_post_ra>
// kernel: tpu_custom_call.1
= control target key start
LH: loop header
LB: loop body
LE: loop exit
PB: predicated region body
PF: predicated region fallthrough
CT: control target
= control target key end

     0   :  { %12 = vsyncpa [#allocation3], 0  ;;  %s1322_s0 = inlined_call_operand.hbm [shape: f32[256,128], index: 0, kind: input, shape index: {}]   ;;  %s1323_s1 = inlined_call_operand.hbm [shape: f32[128,256], index: 1, kind: input, shape index: {}]   ;;  %s1324_s2 = inlined_call_operand.vmem [shape: f32[1,256], index: 2, kind: input, shape index: {}]   ;;  %s1325_s3 = inlined_call_operand.hbm [shape: f32[256,128], index: 3, kind: input, shape index: {}]   ;;  %s1326_s4 = inlined_call_operand.vmem [shape: f32[1,128], index: 4, kind: input, shape index: {}]   ;;  %s1327_s5 = inlined_call_operand.hbm [shape: f32[256,256], index: 5, kind: output, shape index: {0}]   ;;  %s1328_s6 = inlined_call_operand.hbm [shape: f32[256,128], index: 6, kind: output, shape index: {1}]  }
   0x1   :  { %13 = vsyncpa [#allocation6], 0 }
   0x2   :  { %14 = vsyncpa [#allocation4], 0 }
   0x3   :  { %15 = vsyncpa [#allocation10], 0  ;;  %s1039_s21 = smov [#allocation5]  }
   0x4   :  { %s33_s22 = sshll.u32 %s1039_s21, 4  ;;  %s34_s22 = int_to_ptr.vmem [resolvable:$true] %s33_s22 }
   0x5   :  { %s939_s23 = scalar_lea.vmem %s34_s22, 4096  ;;  %p944_p1 = scmp.lt.s32.totalorder %s34_s22, %s34_s22 }
   0x6   :  { %p940_p0 = scmp.ne.s32.totalorder %s34_s22, %s939_s23  ;;  %p945_p2 = scmp.lt.s32.totalorder %s939_s23, %s939_s23 }
   0x8   :  { %p946_p3 = por %p945_p2, %p944_p1 }
   0xa   :  { %p947_p4 = pnand %p946_p3, %p940_p0 }
   0xc   :  { %950 = shalt.err (!%p947_p4)
}
   0xd   :  { %s1040_s24 = smov 256   ;;  %s1041_s25 = smov 16  }
   0xe   :  { %39 = dma.hbm_to_vmem [thread:$0]  %s1323_s1, 4096, %s34_s22, [#allocation6], %s1040_s24, %s1040_s24, %s1041_s25  }
   0xf   :  { %s1042_s28 = smov [#allocation2]  }
  0x10   :  { %s21_s29 = sshll.u32 %s1042_s28, 4  ;;  %s22_s29 = int_to_ptr.vmem [resolvable:$true] %s21_s29 }
  0x11   :  { %s959_s30 = scalar_lea.vmem %s22_s29, 4096  ;;  %p964_p6 = scmp.lt.s32.totalorder %s22_s29, %s22_s29 }
  0x12   :  { %p960_p5 = scmp.ne.s32.totalorder %s22_s29, %s959_s30  ;;  %p965_p7 = scmp.lt.s32.totalorder %s959_s30, %s959_s30 }
  0x14   :  { %p966_p8 = por %p965_p7, %p964_p6 }
  0x16   :  { %p967_p9 = pnand %p966_p8, %p960_p5 }
  0x18   :  { %970 = shalt.err (!%p967_p9)
}
  0x19   :  { %s1043_s7 = smov 128   ;;  %s1044_s8 = smov 8  }
  0x1a   :  { %27 = dma.hbm_to_vmem [thread:$0]  %s1322_s0, 4096, %s22_s29, [#allocation3], %s1043_s7, %s1043_s7, %s1044_s8  }
  0x1b   :  { %s1045_s1 = smov [#allocation7]  }
  0x1c   :  { %s47_s11 = sshll.u32 %s1045_s1, 4  ;;  %s48_s11 = int_to_ptr.vmem [resolvable:$true] %s47_s11 }
  0x1d   :  { %s979_s12 = scalar_lea.vmem %s48_s11, 4096  ;;  %p984_p11 = scmp.lt.s32.totalorder %s48_s11, %s48_s11 }
  0x1e   :  { %p980_p10 = scmp.ne.s32.totalorder %s48_s11, %s979_s12  ;;  %p985_p12 = scmp.lt.s32.totalorder %s979_s12, %s979_s12 }
  0x20   :  { %p986_p13 = por %p985_p12, %p984_p11 }
  0x22   :  { %p987_p0 = pnand %p986_p13, %p980_p10 }
  0x24   :  { %990 = shalt.err (!%p987_p0)
}
  0x25   :  { %53 = dma.hbm_to_vmem [thread:$0]  %s1325_s3, 4096, %s48_s11, [#allocation6], %s1043_s7, %s1043_s7, %s1044_s8  }
  0x26   :  { %1031 = dma.done.wait [#allocation3], 4096  }
  0x27   :  { %1032 = vsyncadd [#allocation3], 4294963200 }
  0x28   :  { %1033 = dma.done.wait [#allocation6], 8192  }
  0x29   :  { %1034 = vsyncadd [#allocation6], 4294959104  ;;  %v1046_v0 = vmov 0.0   ;;  %v128_v1 = vld [vmem:[#allocation5 + $0xf8] sm:$0xff]  ;;  %v127_v2 = vld [vmem:[#allocation5 + $0xf0] sm:$0xff]  ;;  %s1047_s16 = smov [#allocation8]  }
  0x2a   :  { %205 = vmatprep.mubr.f32.mxu0 %v1046_v0  ;;  %857 = vmatprep.subr.mxu1 %v1046_v0  ;;  %v126_v3 = vld [vmem:[#allocation5 + $0xe8] sm:$0xff]  ;;  %v125_v4 = vld [vmem:[#allocation5 + $0xe0] sm:$0xff]  ;;  %v124_v5 = vld [vmem:[#allocation5 + $0xd8] sm:$0xff]  ;;  %s827_s17 = sshll.u32 %s1047_s16, 4  ;;  %s828_s17 = int_to_ptr.vmem [resolvable:$true] %s827_s17 }
  0x2b   :  { %141 = vmatprep.subr.mxu0 %v128_v1  ;;  %v123_v6 = vld [vmem:[#allocation5 + $0xd0] sm:$0xff]  ;;  %v122_v7 = vld [vmem:[#allocation5 + $0xc8] sm:$0xff]  ;;  %v121_v8 = vld [vmem:[#allocation5 + $0xc0] sm:$0xff]  ;;  %s991_s18 = scalar_lea.vmem %s828_s17, 8192  ;;  %p996_p2 = scmp.lt.s32.totalorder %s828_s17, %s828_s17 }
  0x2c   :  { %142 = vmatpush1.msra.mxu0 %v127_v2  ;;  %v120_v9 = vld [vmem:[#allocation5 + $0xb8] sm:$0xff]  ;;  %v119_v10 = vld [vmem:[#allocation5 + $0xb0] sm:$0xff]  ;;  %v118_v11 = vld [vmem:[#allocation5 + $0xa8] sm:$0xff]  ;;  %p992_p1 = scmp.ne.s32.totalorder %s828_s17, %s991_s18  ;;  %p997_p3 = scmp.lt.s32.totalorder %s991_s18, %s991_s18 }
  0x2d   :  { %143 = vmatprep.subr.mxu0 %v126_v3  ;;  %v117_v12 = vld [vmem:[#allocation5 + $0xa0] sm:$0xff]  ;;  %v116_v13 = vld [vmem:[#allocation5 + $0x98] sm:$0xff]  ;;  %v115_v14 = vld [vmem:[#allocation5 + $0x90] sm:$0xff] }
  0x2e   :  { %144 = vmatpush1.msra.mxu0 %v125_v4  ;;  %v114_v15 = vld [vmem:[#allocation5 + $0x88] sm:$0xff]  ;;  %v113_v16 = vld [vmem:[#allocation5 + $0x80] sm:$0xff]  ;;  %v112_v17 = vld [vmem:[#allocation5 + $0x78] sm:$0xff]  ;;  %p998_p4 = por %p997_p3, %p996_p2 }
  0x2f   :  { %145 = vmatprep.subr.mxu0 %v124_v5  ;;  %v111_v18 = vld [vmem:[#allocation5 + $0x70] sm:$0xff]  ;;  %v110_v19 = vld [vmem:[#allocation5 + $0x68] sm:$0xff]  ;;  %v109_v20 = vld [vmem:[#allocation5 + $0x60] sm:$0xff] }
  0x30   :  { %146 = vmatpush1.msra.mxu0 %v123_v6  ;;  %v108_v21 = vld [vmem:[#allocation5 + $0x58] sm:$0xff]  ;;  %v107_v22 = vld [vmem:[#allocation5 + $0x50] sm:$0xff]  ;;  %v106_v23 = vld [vmem:[#allocation5 + $0x48] sm:$0xff]  ;;  %p999_p5 = pnand %p998_p4, %p992_p1 }
  0x31   :  { %147 = vmatprep.subr.mxu0 %v122_v7  ;;  %v105_v24 = vld [vmem:[#allocation5 + $0x40] sm:$0xff]  ;;  %v104_v25 = vld [vmem:[#allocation5 + $0x38] sm:$0xff]  ;;  %v103_v26 = vld [vmem:[#allocation5 + $0x30] sm:$0xff] }
  0x32   :  { %148 = vmatpush1.msra.mxu0 %v121_v8  ;;  %v102_v27 = vld [vmem:[#allocation5 + $0x28] sm:$0xff]  ;;  %v101_v28 = vld [vmem:[#allocation5 + $0x20] sm:$0xff]  ;;  %v100_v29 = vld [vmem:[#allocation5 + $0x18] sm:$0xff] }
  0x33   :  { %149 = vmatprep.subr.mxu0 %v120_v9  ;;  %v99_v30 = vld [vmem:[#allocation5 + $0x10] sm:$0xff]  ;;  %v98_v31 = vld [vmem:[#allocation5 + $0x8] sm:$0xff]  ;;  %v97_v32 = vld [vmem:[#allocation5] sm:$0xff] }
  0x34   :  { %150 = vmatpush1.msra.mxu0 %v119_v10  ;;  %v541_v33 = vld [vmem:[#allocation7 + $0x78] sm:$0xff]  ;;  %v65_v34 = vld [vmem:[#allocation2] sm:$0xff]  ;;  %v540_v35 = vld [vmem:[#allocation7 + $0x70] sm:$0xff] }
  0x35   :  { %151 = vmatprep.subr.mxu0 %v118_v11  ;;  %889 = vmatpush1.msra.mxu1 %v541_v33  ;;  %v66_v36 = vld [vmem:[#allocation2 + $0x8] sm:$0xff]  ;;  %v538_v38 = vld [vmem:[#allocation7 + $0x60] sm:$0xff]  ;;  %v67_v39 = vld [vmem:[#allocation2 + $0x10] sm:$0xff] }
  0x36   :  { %152 = vmatpush1.msra.mxu0 %v117_v12  ;;  %858 = vmatprep.subr.mxu1 %v1046_v0  ;;  %v539_v37 = vld [vmem:[#allocation7 + $0x68] sm:$0xff]  ;;  %v537_v40 = vld [vmem:[#allocation7 + $0x58] sm:$0xff]  ;;  %v536_v41 = vld [vmem:[#allocation7 + $0x50] sm:$0xff] }
  0x37   :  { %153 = vmatprep.subr.mxu0 %v116_v13  ;;  %890 = vmatpush1.msra.mxu1 %v540_v35  ;;  %v68_v42 = vld [vmem:[#allocation2 + $0x18] sm:$0xff]  ;;  %v535_v43 = vld [vmem:[#allocation7 + $0x48] sm:$0xff]  ;;  %v534_v44 = vld [vmem:[#allocation7 + $0x40] sm:$0xff] }
  0x38   :  { %154 = vmatpush1.msra.mxu0 %v115_v14  ;;  %859 = vmatprep.subr.mxu1 %v1046_v0  ;;  %v69_v45 = vld [vmem:[#allocation2 + $0x20] sm:$0xff]  ;;  %v533_v46 = vld [vmem:[#allocation7 + $0x38] sm:$0xff]  ;;  %v532_v47 = vld [vmem:[#allocation7 + $0x30] sm:$0xff] }
  0x39   :  { %155 = vmatprep.subr.mxu0 %v114_v15  ;;  %891 = vmatpush1.msra.mxu1 %v539_v37  ;;  %v70_v48 = vld [vmem:[#allocation2 + $0x28] sm:$0xff]  ;;  %v530_v50 = vld [vmem:[#allocation7 + $0x20] sm:$0xff]  ;;  %v71_v51 = vld [vmem:[#allocation2 + $0x30] sm:$0xff] }
  0x3a   :  { %156 = vmatpush1.msra.mxu0 %v113_v16  ;;  %860 = vmatprep.subr.mxu1 %v1046_v0  ;;  %v531_v49 = vld [vmem:[#allocation7 + $0x28] sm:$0xff]  ;;  %v529_v52 = vld [vmem:[#allocation7 + $0x18] sm:$0xff]  ;;  %v528_v53 = vld [vmem:[#allocation7 + $0x10] sm:$0xff] }
  0x3b   :  { %157 = vmatprep.subr.mxu0 %v112_v17  ;;  %892 = vmatpush1.msra.mxu1 %v538_v38  ;;  %v72_v54 = vld [vmem:[#allocation2 + $0x38] sm:$0xff]  ;;  %v527_v55 = vld [vmem:[#allocation7 + $0x8] sm:$0xff]  ;;  %v526_v56 = vld [vmem:[#allocation7] sm:$0xff] }
  0x3c   :  { %158 = vmatpush1.msra.mxu0 %v111_v18  ;;  %861 = vmatprep.subr.mxu1 %v1046_v0  ;;  %v73_v57 = vld [vmem:[#allocation2 + $0x40] sm:$0xff]  ;;  %v557_v58 = vld [vmem:[#allocation7 + $0xf8] sm:$0xff]  ;;  %v556_v59 = vld [vmem:[#allocation7 + $0xf0] sm:$0xff] }
  0x3d   :  { %159 = vmatprep.subr.mxu0 %v110_v19  ;;  %893 = vmatpush1.msra.mxu1 %v537_v40  ;;  %v74_v60 = vld [vmem:[#allocation2 + $0x48] sm:$0xff]  ;;  %v554_v62 = vld [vmem:[#allocation7 + $0xe0] sm:$0xff]  ;;  %v75_v63 = vld [vmem:[#allocation2 + $0x50] sm:$0xff] }
  0x3e   :  { %160 = vmatpush1.msra.mxu0 %v109_v20  ;;  %862 = vmatprep.subr.mxu1 %v1046_v0  ;;  %v555_v61 = vld [vmem:[#allocation7 + $0xe8] sm:$0xff]  ;;  %v553_v1 = vld [vmem:[#allocation7 + $0xd8] sm:$0xff]  ;;  %v552_v3 = vld [vmem:[#allocation7 + $0xd0] sm:$0xff] }
  0x3f   :  { %161 = vmatprep.subr.mxu0 %v108_v21  ;;  %894 = vmatpush1.msra.mxu1 %v536_v41  ;;  %v76_v2 = vld [vmem:[#allocation2 + $0x58] sm:$0xff]  ;;  %v1150_v4 = vld [vmem:[#allocation7 + $0xc8] sm:$0xff]  ;;  %v77_v5 = vld [vmem:[#allocation2 + $0x60] sm:$0xff] }
  0x40   :  { %162 = vmatpush1.msra.mxu0 %v107_v22  ;;  %863 = vmatprep.subr.mxu1 %v1046_v0  ;;  %v550_v6 = vld [vmem:[#allocation7 + $0xc0] sm:$0xff]  ;;  %v78_v7 = vld [vmem:[#allocation2 + $0x68] sm:$0xff]  ;;  %v549_v8 = vld [vmem:[#allocation7 + $0xb8] sm:$0xff] }
  0x41   :  { %163 = vmatprep.subr.mxu0 %v106_v23  ;;  %895 = vmatpush1.msra.mxu1 %v535_v43  ;;  %v548_v9 = vld [vmem:[#allocation7 + $0xb0] sm:$0xff]  ;;  %v547_v11 = vld [vmem:[#allocation7 + $0xa8] sm:$0xff]  ;;  %v80_v12 = vld [vmem:[#allocation2 + $0x78] sm:$0xff] }
  0x42   :  { %164 = vmatpush1.msra.mxu0 %v105_v24  ;;  %864 = vmatprep.subr.mxu1 %v1046_v0  ;;  %v79_v10 = vld [vmem:[#allocation2 + $0x70] sm:$0xff]  ;;  %v546_v13 = vld [vmem:[#allocation7 + $0xa0] sm:$0xff]  ;;  %v545_v15 = vld [vmem:[#allocation7 + $0x98] sm:$0xff] }
  0x43   :  { %165 = vmatprep.subr.mxu0 %v104_v25  ;;  %896 = vmatpush1.msra.mxu1 %v534_v44  ;;  %v81_v14 = vld [vmem:[#allocation2 + $0x80] sm:$0xff]  ;;  %v82_v16 = vld [vmem:[#allocation2 + $0x88] sm:$0xff]  ;;  %v544_v17 = vld [vmem:[#allocation7 + $0x90] sm:$0xff] }
  0x44   :  { %166 = vmatpush1.msra.mxu0 %v103_v26  ;;  %865 = vmatprep.subr.mxu1 %v1046_v0  ;;  %v543_v18 = vld [vmem:[#allocation7 + $0x88] sm:$0xff]  ;;  %v83_v19 = vld [vmem:[#allocation2 + $0x90] sm:$0xff]  ;;  %v542_v20 = vld [vmem:[#allocation7 + $0x80] sm:$0xff] }
  0x45   :  { %167 = vmatprep.subr.mxu0 %v102_v27  ;;  %897 = vmatpush1.msra.mxu1 %v533_v46  ;;  %v84_v21 = vld [vmem:[#allocation2 + $0x98] sm:$0xff]  ;;  %v85_v22 = vld [vmem:[#allocation2 + $0xa0] sm:$0xff]  ;;  %v86_v23 = vld [vmem:[#allocation2 + $0xa8] sm:$0xff] }
  0x46   :  { %168 = vmatpush1.msra.mxu0 %v101_v28  ;;  %866 = vmatprep.subr.mxu1 %v1046_v0  ;;  %v87_v24 = vld [vmem:[#allocation2 + $0xb0] sm:$0xff]  ;;  %v88_v25 = vld [vmem:[#allocation2 + $0xb8] sm:$0xff]  ;;  %v89_v26 = vld [vmem:[#allocation2 + $0xc0] sm:$0xff] }
  0x47   :  { %169 = vmatprep.subr.mxu0 %v100_v29  ;;  %898 = vmatpush1.msra.mxu1 %v532_v47  ;;  %v90_v27 = vld [vmem:[#allocation2 + $0xc8] sm:$0xff]  ;;  %v91_v28 = vld [vmem:[#allocation2 + $0xd0] sm:$0xff]  ;;  %v92_v29 = vld [vmem:[#allocation2 + $0xd8] sm:$0xff] }
  0x48   :  { %170 = vmatpush1.msra.mxu0 %v99_v30  ;;  %867 = vmatprep.subr.mxu1 %v1046_v0  ;;  %v93_v30 = vld [vmem:[#allocation2 + $0xe0] sm:$0xff] }
  0x49   :  { %171 = vmatprep.subr.mxu0 %v98_v31  ;;  %899 = vmatpush1.msra.mxu1 %v531_v49  ;;  %v94_v31 = vld [vmem:[#allocation2 + $0xe8] sm:$0xff] }
  0x4a   :  { %172 = vmatpush1.msra.mxu0 %v97_v32  ;;  %868 = vmatprep.subr.mxu1 %v1046_v0  ;;  %v95_v32 = vld [vmem:[#allocation2 + $0xf0] sm:$0xff] }
  0x4b   :  { %206 = vmatmul.mubr.f32.vlgmr.msra.gmra.mxu0 %v65_v34  ;;  %565 = vmatprep.subr.mxu0 %v1046_v0  ;;  %v131_v34 = vlaneseq }
  0x4c   :  { %211 = vmatprep.mubr.f32.mxu0 %v1046_v0  ;;  %566 = vmatpush1.msra.mxu0 %v541_v33  ;;  %v96_v33 = vld [vmem:[#allocation2 + $0xf8] sm:$0xff] }
  0x4d   :  { %567 = vmatprep.subr.mxu0 %v1046_v0  ;;  %900 = vmatpush1.msra.mxu1 %v530_v50 }
  0x4e   :  { %568 = vmatpush1.msra.mxu0 %v540_v35  ;;  %869 = vmatprep.subr.mxu1 %v1046_v0  ;;  %v132_v35 = vshrl.u32 %v131_v34, 7 }
  0x4f   :  { %212 = vmatmul.mubr.f32.gmra.mxu0 %v66_v36  ;;  %569 = vmatprep.subr.mxu0 %v1046_v0 }
  0x50   :  { %217 = vmatprep.mubr.f32.mxu0 %v1046_v0  ;;  %570 = vmatpush1.msra.mxu0 %v539_v37  ;;  %v133_v36 = vsub.s32 0, %v132_v35  ;;  %v129_v37 = vld [vmem:[%s1324_s2] sm:$0x3] }
  0x51   :  { %571 = vmatprep.subr.mxu0 %v1046_v0  ;;  %901 = vmatpush1.msra.mxu1 %v529_v52 }
  0x52   :  { %572 = vmatpush1.msra.mxu0 %v538_v38  ;;  %870 = vmatprep.subr.mxu1 %v1046_v0  ;;  %v137_v38 = vsub.s32 1, %v132_v35 }
  0x53   :  { %218 = vmatmul.mubr.f32.gmra.mxu0 %v67_v39  ;;  %573 = vmatprep.subr.mxu0 %v1046_v0  ;;  %v1205_v39 = vrot.slane %v129_v37, %v133_v36 }
  0x54   :  { %223 = vmatprep.mubr.f32.mxu0 %v1046_v0  ;;  %574 = vmatpush1.msra.mxu0 %v537_v40  ;;  %v1207_v40 = vrot.slane %v129_v37, %v137_v38 }
  0x55   :  { %575 = vmatprep.subr.mxu0 %v1046_v0  ;;  %902 = vmatpush1.msra.mxu1 %v528_v53 }
  0x56   :  { %576 = vmatpush1.msra.mxu0 %v536_v41  ;;  %871 = vmatprep.subr.mxu1 %v1046_v0 }
  0x57   :  { %224 = vmatmul.mubr.f32.gmra.mxu0 %v68_v42  ;;  %577 = vmatprep.subr.mxu0 %v1046_v0 }
  0x58   :  { %229 = vmatprep.mubr.f32.mxu0 %v1046_v0  ;;  %578 = vmatpush1.msra.mxu0 %v535_v43 }
  0x59   :  { %579 = vmatprep.subr.mxu0 %v1046_v0  ;;  %903 = vmatpush1.msra.mxu1 %v527_v55 }
  0x5a   :  { %580 = vmatpush1.msra.mxu0 %v534_v44  ;;  %872 = vmatprep.subr.mxu1 %v1046_v0 }
  0x5b   :  { %230 = vmatmul.mubr.f32.gmra.mxu0 %v69_v45  ;;  %581 = vmatprep.subr.mxu0 %v1046_v0 }
  0x5c   :  { %235 = vmatprep.mubr.f32.mxu0 %v1046_v0  ;;  %582 = vmatpush1.msra.mxu0 %v533_v46 }
  0x5d   :  { %583 = vmatprep.subr.mxu0 %v1046_v0  ;;  %904 = vmatpush1.msra.mxu1 %v526_v56 }
  0x5e   :  { %584 = vmatpush1.msra.mxu0 %v532_v47  ;;  %873 = vmatprep.subr.mxu1 %v1046_v0 }
  0x5f   :  { %236 = vmatmul.mubr.f32.gmra.mxu0 %v70_v48  ;;  %585 = vmatprep.subr.mxu0 %v1046_v0 }
  0x60   :  { %241 = vmatprep.mubr.f32.mxu0 %v1046_v0  ;;  %586 = vmatpush1.msra.mxu0 %v531_v49 }
  0x61   :  { %587 = vmatprep.subr.mxu0 %v1046_v0  ;;  %905 = vmatpush2.msra.mxu1 %v557_v58 }
  0x62   :  { %588 = vmatpush1.msra.mxu0 %v530_v50  ;;  %874 = vmatprep.subr.mxu1 %v1046_v0 }
  0x63   :  { %242 = vmatmul.mubr.f32.gmra.mxu0 %v71_v51  ;;  %589 = vmatprep.subr.mxu0 %v1046_v0 }
  0x64   :  { %247 = vmatprep.mubr.f32.mxu0 %v1046_v0  ;;  %590 = vmatpush1.msra.mxu0 %v529_v52 }
  0x65   :  { %591 = vmatprep.subr.mxu0 %v1046_v0  ;;  %906 = vmatpush2.msra.mxu1 %v556_v59 }
  0x66   :  { %592 = vmatpush1.msra.mxu0 %v528_v53  ;;  %875 = vmatprep.subr.mxu1 %v1046_v0 }
  0x67   :  { %248 = vmatmul.mubr.f32.gmra.mxu0 %v72_v54  ;;  %593 = vmatprep.subr.mxu0 %v1046_v0 }
  0x68   :  { %253 = vmatprep.mubr.f32.mxu0 %v1046_v0  ;;  %594 = vmatpush1.msra.mxu0 %v527_v55 }
  0x69   :  { %595 = vmatprep.subr.mxu0 %v1046_v0  ;;  %907 = vmatpush2.msra.mxu1 %v555_v61 }
  0x6a   :  { %596 = vmatpush1.msra.mxu0 %v526_v56  ;;  %876 = vmatprep.subr.mxu1 %v1046_v0 }
  0x6b   :  { %254 = vmatmul.mubr.f32.gmra.mxu0 %v73_v57  ;;  %597 = vmatprep.subr.mxu0 %v1046_v0 }
  0x6c   :  { %259 = vmatprep.mubr.f32.mxu0 %v1046_v0  ;;  %598 = vmatpush2.msra.mxu0 %v557_v58 }
  0x6d   :  { %599 = vmatprep.subr.mxu0 %v1046_v0  ;;  %908 = vmatpush2.msra.mxu1 %v554_v62 }
  0x6e   :  { %600 = vmatpush2.msra.mxu0 %v556_v59  ;;  %877 = vmatprep.subr.mxu1 %v1046_v0 }
  0x6f   :  { %260 = vmatmul.mubr.f32.gmra.mxu0 %v74_v60  ;;  %601 = vmatprep.subr.mxu0 %v1046_v0 }
  0x70   :  { %265 = vmatprep.mubr.f32.mxu0 %v1046_v0  ;;  %602 = vmatpush2.msra.mxu0 %v555_v61 }
  0x71   :  { %603 = vmatprep.subr.mxu0 %v1046_v0  ;;  %909 = vmatpush2.msra.mxu1 %v553_v1 }
  0x72   :  { %604 = vmatpush2.msra.mxu0 %v554_v62  ;;  %878 = vmatprep.subr.mxu1 %v1046_v0 }
  0x73   :  { %266 = vmatmul.mubr.f32.gmra.mxu0 %v75_v63  ;;  %605 = vmatprep.subr.mxu0 %v1046_v0 }
  0x74   :  { %271 = vmatprep.mubr.f32.mxu0 %v1046_v0  ;;  %606 = vmatpush2.msra.mxu0 %v553_v1 }
  0x75   :  { %607 = vmatprep.subr.mxu0 %v1046_v0  ;;  %910 = vmatpush2.msra.mxu1 %v552_v3 }
  0x76   :  { %608 = vmatpush2.msra.mxu0 %v552_v3  ;;  %879 = vmatprep.subr.mxu1 %v1046_v0 }
  0x77   :  { %272 = vmatmul.mubr.f32.gmra.mxu0 %v76_v2  ;;  %609 = vmatprep.subr.mxu0 %v1046_v0 }
  0x78   :  { %277 = vmatprep.mubr.f32.mxu0 %v1046_v0  ;;  %610 = vmatpush2.msra.mxu0 %v1150_v4 }
  0x79   :  { %611 = vmatprep.subr.mxu0 %v1046_v0  ;;  %911 = vmatpush2.msra.mxu1 %v1150_v4 }
  0x7a   :  { %612 = vmatpush2.msra.mxu0 %v550_v6  ;;  %880 = vmatprep.subr.mxu1 %v1046_v0 }
  0x7b   :  { %278 = vmatmul.mubr.f32.gmra.mxu0 %v77_v5  ;;  %613 = vmatprep.subr.mxu0 %v1046_v0 }
  0x7c   :  { %283 = vmatprep.mubr.f32.mxu0 %v1046_v0  ;;  %614 = vmatpush2.msra.mxu0 %v549_v8 }
  0x7d   :  { %615 = vmatprep.subr.mxu0 %v1046_v0  ;;  %912 = vmatpush2.msra.mxu1 %v550_v6 }
  0x7e   :  { %616 = vmatpush2.msra.mxu0 %v548_v9  ;;  %881 = vmatprep.subr.mxu1 %v1046_v0 }
  0x7f   :  { %284 = vmatmul.mubr.f32.gmra.mxu0 %v78_v7  ;;  %617 = vmatprep.subr.mxu0 %v1046_v0 }
  0x80   :  { %289 = vmatprep.mubr.f32.mxu0 %v1046_v0  ;;  %618 = vmatpush2.msra.mxu0 %v547_v11 }
  0x81   :  { %619 = vmatprep.subr.mxu0 %v1046_v0  ;;  %913 = vmatpush2.msra.mxu1 %v549_v8 }
  0x82   :  { %620 = vmatpush2.msra.mxu0 %v546_v13  ;;  %882 = vmatprep.subr.mxu1 %v1046_v0 }
  0x83   :  { %290 = vmatmul.mubr.f32.gmra.mxu0 %v79_v10  ;;  %621 = vmatprep.subr.mxu0 %v1046_v0 }
  0x84   :  { %295 = vmatprep.mubr.f32.mxu0 %v1046_v0  ;;  %622 = vmatpush2.msra.mxu0 %v545_v15 }
  0x85   :  { %623 = vmatprep.subr.mxu0 %v1046_v0  ;;  %914 = vmatpush2.msra.mxu1 %v548_v9 }
  0x86   :  { %624 = vmatpush2.msra.mxu0 %v544_v17  ;;  %883 = vmatprep.subr.mxu1 %v1046_v0 }
  0x87   :  { %296 = vmatmul.mubr.f32.gmra.mxu0 %v80_v12  ;;  %625 = vmatprep.subr.mxu0 %v1046_v0 }
  0x88   :  { %301 = vmatprep.mubr.f32.mxu0 %v1046_v0  ;;  %626 = vmatpush2.msra.mxu0 %v543_v18 }
  0x89   :  { %627 = vmatprep.subr.mxu0 %v1046_v0  ;;  %915 = vmatpush2.msra.mxu1 %v547_v11 }
  0x8a   :  { %628 = vmatpush2.msra.mxu0 %v542_v20  ;;  %884 = vmatprep.subr.mxu1 %v1046_v0 }
  0x8b   :  { %302 = vmatmul.mubr.f32.gmra.mxu0 %v81_v14  ;;  %916 = vmatpush2.msra.mxu1 %v546_v13 }
  0x8c   :  { %307 = vmatprep.mubr.f32.mxu0 %v1046_v0  ;;  %885 = vmatprep.subr.mxu1 %v1046_v0 }
  0x8d   :  { %917 = vmatpush2.msra.mxu1 %v545_v15 }
  0x8e   :  { %886 = vmatprep.subr.mxu1 %v1046_v0 }
  0x8f   :  { %308 = vmatmul.mubr.f32.gmra.mxu0 %v82_v16  ;;  %918 = vmatpush2.msra.mxu1 %v544_v17 }
  0x90   :  { %313 = vmatprep.mubr.f32.mxu0 %v1046_v0  ;;  %887 = vmatprep.subr.mxu1 %v1046_v0 }
  0x91   :  { %919 = vmatpush2.msra.mxu1 %v543_v18 }
  0x92   :  { %888 = vmatprep.subr.mxu1 %v1046_v0 }
  0x93   :  { %314 = vmatmul.mubr.f32.gmra.mxu0 %v83_v19  ;;  %920 = vmatpush2.msra.mxu1 %v542_v20 }
  0x94   :  { %319 = vmatprep.mubr.f32.mxu0 %v1046_v0 }
  0x97   :  { %320 = vmatmul.mubr.f32.gmra.mxu0 %v84_v21 }
  0x98   :  { %325 = vmatprep.mubr.f32.mxu0 %v1046_v0 }
  0x9b   :  { %326 = vmatmul.mubr.f32.gmra.mxu0 %v85_v22 }
  0x9c   :  { %331 = vmatprep.mubr.f32.mxu0 %v1046_v0 }
  0x9f   :  { %332 = vmatmul.mubr.f32.gmra.mxu0 %v86_v23 }
  0xa0   :  { %337 = vmatprep.mubr.f32.mxu0 %v1046_v0 }
  0xa3   :  { %338 = vmatmul.mubr.f32.gmra.mxu0 %v87_v24 }
  0xa4   :  { %343 = vmatprep.mubr.f32.mxu0 %v1046_v0 }
  0xa7   :  { %344 = vmatmul.mubr.f32.gmra.mxu0 %v88_v25 }
  0xa8   :  { %349 = vmatprep.mubr.f32.mxu0 %v1046_v0 }
  0xab   :  { %350 = vmatmul.mubr.f32.gmra.mxu0 %v89_v26 }
  0xac   :  { %355 = vmatprep.mubr.f32.mxu0 %v1046_v0 }
  0xaf   :  { %356 = vmatmul.mubr.f32.gmra.mxu0 %v90_v27 }
  0xb0   :  { %361 = vmatprep.mubr.f32.mxu0 %v1046_v0 }
  0xb3   :  { %362 = vmatmul.mubr.f32.gmra.mxu0 %v91_v28 }
  0xb4   :  { %367 = vmatprep.mubr.f32.mxu0 %v1046_v0 }
  0xb7   :  { %368 = vmatmul.mubr.f32.gmra.mxu0 %v92_v29 }
  0xb8   :  { %373 = vmatprep.mubr.f32.mxu0 %v1046_v0 }
  0xbb   :  { %374 = vmatmul.mubr.f32.gmra.mxu0 %v93_v30 }
  0xbc   :  { %379 = vmatprep.mubr.f32.mxu0 %v1046_v0 }
  0xbf   :  { %380 = vmatmul.mubr.f32.gmra.mxu0 %v94_v31 }
  0xc0   :  { %385 = vmatprep.mubr.f32.mxu0 %v1046_v0 }
  0xc3   :  { %386 = vmatmul.mubr.f32.gmra.mxu0 %v95_v32 }
  0xc4   :  { %391 = vmatprep.mubr.f32.mxu0 %v1046_v0 }
  0xc7   :  { %392 = vmatmul.mubr.f32.gmra.mxu0 %v96_v33 }
 0x10b   :  { %v207_v41 = vpop.f32.mrf.mxu0 }
 0x10c   :  { %v208_v42 = vadd.f32 %v207_v41, %v1205_v39 }
 0x10d   :  { %v209_v43 = vpop.f32.mrf.mxu0 }
 0x10e   :  { %v398_v44 = vmax.f32 %v208_v42, 0.0  ;;  %v210_v0 = vadd.f32 %v209_v43, %v1207_v40 }
 0x10f   :  { %v213_v45 = vpop.f32.mrf.mxu0 }
 0x110   :  { %462 = vst [vmem:[#allocation8] sm:$0xff] %v398_v44  ;;  %v399_v46 = vmax.f32 %v210_v0, 0.0  ;;  %v214_v47 = vadd.f32 %v213_v45, %v1205_v39 }
 0x111   :  { %v215_v48 = vpop.f32.mrf.mxu0 }
 0x112   :  { %463 = vst [vmem:[#allocation8 + $0x8] sm:$0xff] %v399_v46  ;;  %v400_v49 = vmax.f32 %v214_v47, 0.0  ;;  %v216_v50 = vadd.f32 %v215_v48, %v1207_v40  ;;  %629 = vmatprep.mubr.f32.mxu0 %v399_v46 }
 0x113   :  { %v219_v51 = vpop.f32.mrf.mxu0  ;;  %630 = vmatmul.mubr.f32.vlgmr.msra.gmra.mxu0 %v398_v44 }
 0x114   :  { %464 = vst [vmem:[#allocation8 + $0x10] sm:$0xff] %v400_v49  ;;  %v401_v52 = vmax.f32 %v216_v50, 0.0  ;;  %v220_v53 = vadd.f32 %v219_v51, %v1205_v39 }
 0x115   :  { %v221_v54 = vpop.f32.mrf.mxu0 }
 0x116   :  { %465 = vst [vmem:[#allocation8 + $0x18] sm:$0xff] %v401_v52  ;;  %v402_v55 = vmax.f32 %v220_v53, 0.0  ;;  %v222_v56 = vadd.f32 %v221_v54, %v1207_v40  ;;  %634 = vmatprep.mubr.f32.mxu0 %v401_v52 }
 0x117   :  { %v225_v57 = vpop.f32.mrf.mxu0  ;;  %635 = vmatmul.mubr.f32.gmra.mxu0 %v400_v49 }
 0x118   :  { %466 = vst [vmem:[#allocation8 + $0x20] sm:$0xff] %v402_v55  ;;  %v403_v58 = vmax.f32 %v222_v56, 0.0  ;;  %v226_v59 = vadd.f32 %v225_v57, %v1205_v39 }
 0x119   :  { %v227_v60 = vpop.f32.mrf.mxu0 }
 0x11a   :  { %467 = vst [vmem:[#allocation8 + $0x28] sm:$0xff] %v403_v58  ;;  %v404_v61 = vmax.f32 %v226_v59, 0.0  ;;  %v228_v62 = vadd.f32 %v227_v60, %v1207_v40  ;;  %639 = vmatprep.mubr.f32.mxu0 %v403_v58 }
 0x11b   :  { %v231_v63 = vpop.f32.mrf.mxu0  ;;  %640 = vmatmul.mubr.f32.gmra.mxu0 %v402_v55 }
 0x11c   :  { %468 = vst [vmem:[#allocation8 + $0x30] sm:$0xff] %v404_v61  ;;  %v405_v1 = vmax.f32 %v228_v62, 0.0  ;;  %v232_v2 = vadd.f32 %v231_v63, %v1205_v39 }
 0x11d   :  { %v233_v3 = vpop.f32.mrf.mxu0 }
 0x11e   :  { %469 = vst [vmem:[#allocation8 + $0x38] sm:$0xff] %v405_v1  ;;  %v406_v4 = vmax.f32 %v232_v2, 0.0  ;;  %v234_v5 = vadd.f32 %v233_v3, %v1207_v40  ;;  %644 = vmatprep.mubr.f32.mxu0 %v405_v1 }
 0x11f   :  { %v237_v6 = vpop.f32.mrf.mxu0  ;;  %645 = vmatmul.mubr.f32.gmra.mxu0 %v404_v61 }
 0x120   :  { %470 = vst [vmem:[#allocation8 + $0x40] sm:$0xff] %v406_v4  ;;  %v407_v7 = vmax.f32 %v234_v5, 0.0  ;;  %v238_v8 = vadd.f32 %v237_v6, %v1205_v39 }
 0x121   :  { %v239_v9 = vpop.f32.mrf.mxu0 }
 0x122   :  { %471 = vst [vmem:[#allocation8 + $0x48] sm:$0xff] %v407_v7  ;;  %v408_v10 = vmax.f32 %v238_v8, 0.0  ;;  %v240_v11 = vadd.f32 %v239_v9, %v1207_v40  ;;  %649 = vmatprep.mubr.f32.mxu1 %v407_v7 }
 0x123   :  { %v243_v12 = vpop.f32.mrf.mxu0  ;;  %650 = vmatmul.mubr.f32.vlgmr.msra.gmra.mxu1 %v406_v4 }
 0x124   :  { %472 = vst [vmem:[#allocation8 + $0x50] sm:$0xff] %v408_v10  ;;  %v409_v13 = vmax.f32 %v240_v11, 0.0  ;;  %v244_v14 = vadd.f32 %v243_v12, %v1205_v39 }
 0x125   :  { %v245_v15 = vpop.f32.mrf.mxu0 }
 0x126   :  { %473 = vst [vmem:[#allocation8 + $0x58] sm:$0xff] %v409_v13  ;;  %v410_v16 = vmax.f32 %v244_v14, 0.0  ;;  %v246_v17 = vadd.f32 %v245_v15, %v1207_v40  ;;  %654 = vmatprep.mubr.f32.mxu1 %v409_v13 }
 0x127   :  { %v249_v18 = vpop.f32.mrf.mxu0  ;;  %655 = vmatmul.mubr.f32.gmra.mxu1 %v408_v10 }
 0x128   :  { %474 = vst [vmem:[#allocation8 + $0x60] sm:$0xff] %v410_v16  ;;  %v411_v19 = vmax.f32 %v246_v17, 0.0  ;;  %v250_v20 = vadd.f32 %v249_v18, %v1205_v39 }
 0x129   :  { %v251_v21 = vpop.f32.mrf.mxu0 }
 0x12a   :  { %475 = vst [vmem:[#allocation8 + $0x68] sm:$0xff] %v411_v19  ;;  %v412_v22 = vmax.f32 %v250_v20, 0.0  ;;  %v252_v23 = vadd.f32 %v251_v21, %v1207_v40  ;;  %659 = vmatprep.mubr.f32.mxu1 %v411_v19 }
 0x12b   :  { %v255_v24 = vpop.f32.mrf.mxu0  ;;  %660 = vmatmul.mubr.f32.gmra.mxu1 %v410_v16 }
 0x12c   :  { %476 = vst [vmem:[#allocation8 + $0x70] sm:$0xff] %v412_v22  ;;  %v413_v25 = vmax.f32 %v252_v23, 0.0  ;;  %v256_v26 = vadd.f32 %v255_v24, %v1205_v39 }
 0x12d   :  { %v257_v27 = vpop.f32.mrf.mxu0 }
 0x12e   :  { %477 = vst [vmem:[#allocation8 + $0x78] sm:$0xff] %v413_v25  ;;  %v414_v28 = vmax.f32 %v256_v26, 0.0  ;;  %v258_v29 = vadd.f32 %v257_v27, %v1207_v40  ;;  %664 = vmatprep.mubr.f32.mxu1 %v413_v25 }
 0x12f   :  { %v261_v30 = vpop.f32.mrf.mxu0  ;;  %665 = vmatmul.mubr.f32.gmra.mxu1 %v412_v22 }
 0x130   :  { %478 = vst [vmem:[#allocation8 + $0x80] sm:$0xff] %v414_v28  ;;  %v415_v31 = vmax.f32 %v258_v29, 0.0  ;;  %v262_v32 = vadd.f32 %v261_v30, %v1205_v39 }
 0x131   :  { %v263_v33 = vpop.f32.mrf.mxu0 }
 0x132   :  { %479 = vst [vmem:[#allocation8 + $0x88] sm:$0xff] %v415_v31  ;;  %v416_v34 = vmax.f32 %v262_v32, 0.0  ;;  %v264_v35 = vadd.f32 %v263_v33, %v1207_v40  ;;  %669 = vmatprep.mubr.f32.mxu1 %v415_v31 }
 0x133   :  { %v267_v36 = vpop.f32.mrf.mxu0  ;;  %670 = vmatmul.mubr.f32.gmra.mxu1 %v414_v28 }
 0x134   :  { %480 = vst [vmem:[#allocation8 + $0x90] sm:$0xff] %v416_v34  ;;  %v417_v37 = vmax.f32 %v264_v35, 0.0  ;;  %v268_v38 = vadd.f32 %v267_v36, %v1205_v39 }
 0x135   :  { %v269_v41 = vpop.f32.mrf.mxu0 }
 0x136   :  { %481 = vst [vmem:[#allocation8 + $0x98] sm:$0xff] %v417_v37  ;;  %v418_v42 = vmax.f32 %v268_v38, 0.0  ;;  %v270_v43 = vadd.f32 %v269_v41, %v1207_v40  ;;  %674 = vmatprep.mubr.f32.mxu1 %v417_v37 }
 0x137   :  { %v273_v44 = vpop.f32.mrf.mxu0  ;;  %675 = vmatmul.mubr.f32.gmra.mxu1 %v416_v34 }
 0x138   :  { %482 = vst [vmem:[#allocation8 + $0xa0] sm:$0xff] %v418_v42  ;;  %v419_v0 = vmax.f32 %v270_v43, 0.0  ;;  %v274_v45 = vadd.f32 %v273_v44, %v1205_v39 }
 0x139   :  { %v275_v46 = vpop.f32.mrf.mxu0 }
 0x13a   :  { %483 = vst [vmem:[#allocation8 + $0xa8] sm:$0xff] %v419_v0  ;;  %v420_v47 = vmax.f32 %v274_v45, 0.0  ;;  %v276_v48 = vadd.f32 %v275_v46, %v1207_v40  ;;  %679 = vmatprep.mubr.f32.mxu1 %v419_v0 }
 0x13b   :  { %v279_v49 = vpop.f32.mrf.mxu0  ;;  %680 = vmatmul.mubr.f32.gmra.mxu1 %v418_v42 }
 0x13c   :  { %484 = vst [vmem:[#allocation8 + $0xb0] sm:$0xff] %v420_v47  ;;  %v421_v50 = vmax.f32 %v276_v48, 0.0  ;;  %v280_v51 = vadd.f32 %v279_v49, %v1205_v39 }
 0x13d   :  { %v281_v52 = vpop.f32.mrf.mxu0 }
 0x13e   :  { %485 = vst [vmem:[#allocation8 + $0xb8] sm:$0xff] %v421_v50  ;;  %v422_v53 = vmax.f32 %v280_v51, 0.0  ;;  %v282_v54 = vadd.f32 %v281_v52, %v1207_v40  ;;  %684 = vmatprep.mubr.f32.mxu1 %v421_v50 }
 0x13f   :  { %v285_v55 = vpop.f32.mrf.mxu0  ;;  %685 = vmatmul.mubr.f32.gmra.mxu1 %v420_v47 }
 0x140   :  { %486 = vst [vmem:[#allocation8 + $0xc0] sm:$0xff] %v422_v53  ;;  %v423_v56 = vmax.f32 %v282_v54, 0.0  ;;  %v286_v57 = vadd.f32 %v285_v55, %v1205_v39 }
 0x141   :  { %v287_v58 = vpop.f32.mrf.mxu0 }
 0x142   :  { %487 = vst [vmem:[#allocation8 + $0xc8] sm:$0xff] %v423_v56  ;;  %v424_v59 = vmax.f32 %v286_v57, 0.0  ;;  %v288_v60 = vadd.f32 %v287_v58, %v1207_v40  ;;  %689 = vmatprep.mubr.f32.mxu1 %v423_v56 }
 0x143   :  { %v291_v61 = vpop.f32.mrf.mxu0  ;;  %690 = vmatmul.mubr.f32.gmra.mxu1 %v422_v53 }
 0x144   :  { %488 = vst [vmem:[#allocation8 + $0xd0] sm:$0xff] %v424_v59  ;;  %v425_v62 = vmax.f32 %v288_v60, 0.0  ;;  %v292_v63 = vadd.f32 %v291_v61, %v1205_v39 }
 0x145   :  { %v293_v1 = vpop.f32.mrf.mxu0 }
 0x146   :  { %489 = vst [vmem:[#allocation8 + $0xd8] sm:$0xff] %v425_v62  ;;  %v426_v2 = vmax.f32 %v292_v63, 0.0  ;;  %v294_v3 = vadd.f32 %v293_v1, %v1207_v40  ;;  %694 = vmatprep.mubr.f32.mxu1 %v425_v62 }
 0x147   :  { %v297_v4 = vpop.f32.mrf.mxu0  ;;  %695 = vmatmul.mubr.f32.gmra.mxu1 %v424_v59 }
 0x148   :  { %490 = vst [vmem:[#allocation8 + $0xe0] sm:$0xff] %v426_v2  ;;  %v427_v5 = vmax.f32 %v294_v3, 0.0  ;;  %v298_v6 = vadd.f32 %v297_v4, %v1205_v39 }
 0x149   :  { %v299_v7 = vpop.f32.mrf.mxu0 }
 0x14a   :  { %491 = vst [vmem:[#allocation8 + $0xe8] sm:$0xff] %v427_v5  ;;  %v428_v8 = vmax.f32 %v298_v6, 0.0  ;;  %v300_v9 = vadd.f32 %v299_v7, %v1207_v40  ;;  %699 = vmatprep.mubr.f32.mxu1 %v427_v5 }
 0x14b   :  { %v303_v10 = vpop.f32.mrf.mxu0  ;;  %700 = vmatmul.mubr.f32.gmra.mxu1 %v426_v2 }
 0x14c   :  { %492 = vst [vmem:[#allocation8 + $0xf0] sm:$0xff] %v428_v8  ;;  %v429_v11 = vmax.f32 %v300_v9, 0.0  ;;  %v304_v12 = vadd.f32 %v303_v10, %v1205_v39 }
 0x14d   :  { %v305_v13 = vpop.f32.mrf.mxu0 }
 0x14e   :  { %493 = vst [vmem:[#allocation8 + $0xf8] sm:$0xff] %v429_v11  ;;  %v430_v14 = vmax.f32 %v304_v12, 0.0  ;;  %v306_v15 = vadd.f32 %v305_v13, %v1207_v40  ;;  %704 = vmatprep.mubr.f32.mxu1 %v429_v11 }
 0x14f   :  { %v309_v16 = vpop.f32.mrf.mxu0  ;;  %705 = vmatmul.mubr.f32.gmra.mxu1 %v428_v8 }
 0x150   :  { %494 = vst [vmem:[#allocation8 + $0x100] sm:$0xff] %v430_v14  ;;  %v431_v17 = vmax.f32 %v306_v15, 0.0  ;;  %v310_v18 = vadd.f32 %v309_v16, %v1205_v39 }
 0x151   :  { %v311_v19 = vpop.f32.mrf.mxu0 }
 0x152   :  { %495 = vst [vmem:[#allocation8 + $0x108] sm:$0xff] %v431_v17  ;;  %v432_v20 = vmax.f32 %v310_v18, 0.0  ;;  %v312_v21 = vadd.f32 %v311_v19, %v1207_v40  ;;  %709 = vmatprep.mubr.f32.mxu1 %v431_v17 }
 0x153   :  { %v315_v22 = vpop.f32.mrf.mxu0  ;;  %710 = vmatmul.mubr.f32.gmra.mxu1 %v430_v14 }
 0x154   :  { %496 = vst [vmem:[#allocation8 + $0x110] sm:$0xff] %v432_v20  ;;  %v433_v23 = vmax.f32 %v312_v21, 0.0  ;;  %v316_v24 = vadd.f32 %v315_v22, %v1205_v39 }
 0x155   :  { %v317_v25 = vpop.f32.mrf.mxu0 }
 0x156   :  { %497 = vst [vmem:[#allocation8 + $0x118] sm:$0xff] %v433_v23  ;;  %v434_v26 = vmax.f32 %v316_v24, 0.0  ;;  %v318_v27 = vadd.f32 %v317_v25, %v1207_v40  ;;  %714 = vmatprep.mubr.f32.mxu1 %v433_v23 }
 0x157   :  { %v321_v28 = vpop.f32.mrf.mxu0  ;;  %715 = vmatmul.mubr.f32.gmra.mxu1 %v432_v20 }
 0x158   :  { %498 = vst [vmem:[#allocation8 + $0x120] sm:$0xff] %v434_v26  ;;  %v435_v29 = vmax.f32 %v318_v27, 0.0  ;;  %v322_v30 = vadd.f32 %v321_v28, %v1205_v39 }
 0x159   :  { %v323_v31 = vpop.f32.mrf.mxu0 }
 0x15a   :  { %499 = vst [vmem:[#allocation8 + $0x128] sm:$0xff] %v435_v29  ;;  %v436_v32 = vmax.f32 %v322_v30, 0.0  ;;  %v324_v33 = vadd.f32 %v323_v31, %v1207_v40  ;;  %719 = vmatprep.mubr.f32.mxu1 %v435_v29 }
 0x15b   :  { %v327_v34 = vpop.f32.mrf.mxu0  ;;  %720 = vmatmul.mubr.f32.gmra.mxu1 %v434_v26 }
 0x15c   :  { %500 = vst [vmem:[#allocation8 + $0x130] sm:$0xff] %v436_v32  ;;  %v437_v35 = vmax.f32 %v324_v33, 0.0  ;;  %v328_v36 = vadd.f32 %v327_v34, %v1205_v39 }
 0x15d   :  { %v329_v37 = vpop.f32.mrf.mxu0 }
 0x15e   :  { %501 = vst [vmem:[#allocation8 + $0x138] sm:$0xff] %v437_v35  ;;  %v438_v38 = vmax.f32 %v328_v36, 0.0  ;;  %v330_v41 = vadd.f32 %v329_v37, %v1207_v40  ;;  %724 = vmatprep.mubr.f32.mxu1 %v437_v35 }
 0x15f   :  { %v333_v42 = vpop.f32.mrf.mxu0  ;;  %725 = vmatmul.mubr.f32.gmra.mxu1 %v436_v32 }
 0x160   :  { %502 = vst [vmem:[#allocation8 + $0x140] sm:$0xff] %v438_v38  ;;  %v439_v43 = vmax.f32 %v330_v41, 0.0  ;;  %v334_v44 = vadd.f32 %v333_v42, %v1205_v39 }
 0x161   :  { %v335_v0 = vpop.f32.mrf.mxu0 }
 0x162   :  { %503 = vst [vmem:[#allocation8 + $0x148] sm:$0xff] %v439_v43  ;;  %v440_v45 = vmax.f32 %v334_v44, 0.0  ;;  %v336_v46 = vadd.f32 %v335_v0, %v1207_v40  ;;  %729 = vmatprep.mubr.f32.mxu1 %v439_v43 }
 0x163   :  { %v339_v47 = vpop.f32.mrf.mxu0  ;;  %730 = vmatmul.mubr.f32.gmra.mxu1 %v438_v38 }
 0x164   :  { %504 = vst [vmem:[#allocation8 + $0x150] sm:$0xff] %v440_v45  ;;  %v441_v48 = vmax.f32 %v336_v46, 0.0  ;;  %v340_v49 = vadd.f32 %v339_v47, %v1205_v39  ;;  %v1276_v46 = vld [vmem:[%s1326_s4] ss:$0 sm:$0xff] }
 0x165   :  { %v341_v50 = vpop.f32.mrf.mxu0 }
 0x166   :  { %505 = vst [vmem:[#allocation8 + $0x158] sm:$0xff] %v441_v48  ;;  %v442_v51 = vmax.f32 %v340_v49, 0.0  ;;  %v342_v52 = vadd.f32 %v341_v50, %v1207_v40  ;;  %734 = vmatprep.mubr.f32.mxu1 %v441_v48 }
 0x167   :  { %v345_v53 = vpop.f32.mrf.mxu0  ;;  %735 = vmatmul.mubr.f32.gmra.mxu1 %v440_v45 }
 0x168   :  { %506 = vst [vmem:[#allocation8 + $0x160] sm:$0xff] %v442_v51  ;;  %v443_v54 = vmax.f32 %v342_v52, 0.0  ;;  %v346_v55 = vadd.f32 %v345_v53, %v1205_v39 }
 0x169   :  { %v347_v56 = vpop.f32.mrf.mxu0 }
 0x16a   :  { %507 = vst [vmem:[#allocation8 + $0x168] sm:$0xff] %v443_v54  ;;  %v444_v57 = vmax.f32 %v346_v55, 0.0  ;;  %v348_v58 = vadd.f32 %v347_v56, %v1207_v40  ;;  %739 = vmatprep.mubr.f32.mxu1 %v443_v54 }
 0x16b   :  { %v351_v59 = vpop.f32.mrf.mxu0  ;;  %740 = vmatmul.mubr.f32.gmra.mxu1 %v442_v51 }
 0x16c   :  { %508 = vst [vmem:[#allocation8 + $0x170] sm:$0xff] %v444_v57  ;;  %v445_v60 = vmax.f32 %v348_v58, 0.0  ;;  %v352_v61 = vadd.f32 %v351_v59, %v1205_v39 }
 0x16d   :  { %v353_v62 = vpop.f32.mrf.mxu0 }
 0x16e   :  { %509 = vst [vmem:[#allocation8 + $0x178] sm:$0xff] %v445_v60  ;;  %v446_v63 = vmax.f32 %v352_v61, 0.0  ;;  %v354_v1 = vadd.f32 %v353_v62, %v1207_v40  ;;  %744 = vmatprep.mubr.f32.mxu1 %v445_v60 }
 0x16f   :  { %v357_v2 = vpop.f32.mrf.mxu0  ;;  %745 = vmatmul.mubr.f32.gmra.mxu1 %v444_v57 }
 0x170   :  { %510 = vst [vmem:[#allocation8 + $0x180] sm:$0xff] %v446_v63  ;;  %v447_v3 = vmax.f32 %v354_v1, 0.0  ;;  %v358_v4 = vadd.f32 %v357_v2, %v1205_v39 }
 0x171   :  { %v359_v5 = vpop.f32.mrf.mxu0 }
 0x172   :  { %511 = vst [vmem:[#allocation8 + $0x188] sm:$0xff] %v447_v3  ;;  %v448_v6 = vmax.f32 %v358_v4, 0.0  ;;  %v360_v7 = vadd.f32 %v359_v5, %v1207_v40  ;;  %749 = vmatprep.mubr.f32.mxu1 %v447_v3 }
 0x173   :  { %v363_v8 = vpop.f32.mrf.mxu0  ;;  %750 = vmatmul.mubr.f32.gmra.mxu1 %v446_v63 }
 0x174   :  { %512 = vst [vmem:[#allocation8 + $0x190] sm:$0xff] %v448_v6  ;;  %v449_v9 = vmax.f32 %v360_v7, 0.0  ;;  %v364_v10 = vadd.f32 %v363_v8, %v1205_v39 }
 0x175   :  { %v365_v11 = vpop.f32.mrf.mxu0 }
 0x176   :  { %513 = vst [vmem:[#allocation8 + $0x198] sm:$0xff] %v449_v9  ;;  %v450_v12 = vmax.f32 %v364_v10, 0.0  ;;  %v366_v13 = vadd.f32 %v365_v11, %v1207_v40  ;;  %754 = vmatprep.mubr.f32.mxu1 %v449_v9 }
 0x177   :  { %v369_v14 = vpop.f32.mrf.mxu0  ;;  %755 = vmatmul.mubr.f32.gmra.mxu1 %v448_v6 }
 0x178   :  { %514 = vst [vmem:[#allocation8 + $0x1a0] sm:$0xff] %v450_v12  ;;  %v451_v15 = vmax.f32 %v366_v13, 0.0  ;;  %v370_v16 = vadd.f32 %v369_v14, %v1205_v39 }
 0x179   :  { %v371_v17 = vpop.f32.mrf.mxu0 }
 0x17a   :  { %515 = vst [vmem:[#allocation8 + $0x1a8] sm:$0xff] %v451_v15  ;;  %v452_v18 = vmax.f32 %v370_v16, 0.0  ;;  %v372_v19 = vadd.f32 %v371_v17, %v1207_v40  ;;  %759 = vmatprep.mubr.f32.mxu1 %v451_v15 }
 0x17b   :  { %v375_v20 = vpop.f32.mrf.mxu0  ;;  %760 = vmatmul.mubr.f32.gmra.mxu1 %v450_v12 }
 0x17c   :  { %516 = vst [vmem:[#allocation8 + $0x1b0] sm:$0xff] %v452_v18  ;;  %v453_v21 = vmax.f32 %v372_v19, 0.0  ;;  %v376_v22 = vadd.f32 %v375_v20, %v1205_v39 }
 0x17d   :  { %v377_v23 = vpop.f32.mrf.mxu0 }
 0x17e   :  { %517 = vst [vmem:[#allocation8 + $0x1b8] sm:$0xff] %v453_v21  ;;  %v454_v24 = vmax.f32 %v376_v22, 0.0  ;;  %v378_v25 = vadd.f32 %v377_v23, %v1207_v40  ;;  %764 = vmatprep.mubr.f32.mxu1 %v453_v21 }
 0x17f   :  { %v381_v26 = vpop.f32.mrf.mxu0  ;;  %765 = vmatmul.mubr.f32.gmra.mxu1 %v452_v18 }
 0x180   :  { %518 = vst [vmem:[#allocation8 + $0x1c0] sm:$0xff] %v454_v24  ;;  %v455_v27 = vmax.f32 %v378_v25, 0.0  ;;  %v382_v28 = vadd.f32 %v381_v26, %v1205_v39 }
 0x181   :  { %v383_v29 = vpop.f32.mrf.mxu0 }
 0x182   :  { %519 = vst [vmem:[#allocation8 + $0x1c8] sm:$0xff] %v455_v27  ;;  %v456_v30 = vmax.f32 %v382_v28, 0.0  ;;  %v384_v31 = vadd.f32 %v383_v29, %v1207_v40  ;;  %769 = vmatprep.mubr.f32.mxu1 %v455_v27 }
 0x183   :  { %v387_v32 = vpop.f32.mrf.mxu0  ;;  %770 = vmatmul.mubr.f32.gmra.mxu1 %v454_v24 }
 0x184   :  { %520 = vst [vmem:[#allocation8 + $0x1d0] sm:$0xff] %v456_v30  ;;  %v457_v33 = vmax.f32 %v384_v31, 0.0  ;;  %v388_v34 = vadd.f32 %v387_v32, %v1205_v39 }
 0x185   :  { %v389_v35 = vpop.f32.mrf.mxu0 }
 0x186   :  { %521 = vst [vmem:[#allocation8 + $0x1d8] sm:$0xff] %v457_v33  ;;  %v458_v36 = vmax.f32 %v388_v34, 0.0  ;;  %v390_v37 = vadd.f32 %v389_v35, %v1207_v40  ;;  %774 = vmatprep.mubr.f32.mxu1 %v457_v33 }
 0x187   :  { %v393_v38 = vpop.f32.mrf.mxu0  ;;  %775 = vmatmul.mubr.f32.gmra.mxu1 %v456_v30 }
 0x188   :  { %522 = vst [vmem:[#allocation8 + $0x1e0] sm:$0xff] %v458_v36  ;;  %v459_v41 = vmax.f32 %v390_v37, 0.0  ;;  %v394_v42 = vadd.f32 %v393_v38, %v1205_v39 }
 0x189   :  { %v395_v43 = vpop.f32.mrf.mxu0 }
 0x18a   :  { %523 = vst [vmem:[#allocation8 + $0x1e8] sm:$0xff] %v459_v41  ;;  %v460_v44 = vmax.f32 %v394_v42, 0.0  ;;  %v396_v0 = vadd.f32 %v395_v43, %v1207_v40  ;;  %779 = vmatprep.mubr.f32.mxu1 %v459_v41 }
 0x18b   :  { %780 = vmatmul.mubr.f32.gmra.mxu1 %v458_v36 }
 0x18c   :  { %524 = vst [vmem:[#allocation8 + $0x1f0] sm:$0xff] %v460_v44  ;;  %v461_v45 = vmax.f32 %v396_v0, 0.0 }
 0x18e   :  { %525 = vst [vmem:[#allocation8 + $0x1f8] sm:$0xff] %v461_v45  ;;  %784 = vmatprep.mubr.f32.mxu1 %v461_v45 }
 0x18f   :  { %785 = vmatmul.mubr.f32.gmra.mxu1 %v460_v44 }
 0x1d3   :  { %v631_v39 = vpop.f32.mrf.mxu0 }
 0x1d4   :  { %1002 = shalt.err (!%p999_p5)
}
 0x1d5   :  { %833 = dma.vmem_to_hbm [thread:$0]  %s828_s17, 8192, %s1327_s5, [#allocation4], %s1040_s24, %s1040_s24, %s1041_s25   ;;  %v632_v40 = vadd.f32 %v1276_v46, %v631_v39  ;;  %v633_v47 = vpop.f32.mrf.mxu0 }
 0x1d6   :  { %s1048_s4 = smov [#allocation9]  }
 0x1d7   :  { %790 = vst [vmem:[#allocation9] sm:$0xff] %v632_v40  ;;  %v636_v48 = vpop.f32.mrf.mxu0  ;;  %s839_s5 = sshll.u32 %s1048_s4, 4  ;;  %s840_s5 = int_to_ptr.vmem [resolvable:$true] %s839_s5 }
 0x1d8   :  { %v637_v49 = vadd.f32 %v1276_v46, %v636_v48  ;;  %s1011_s21 = scalar_lea.vmem %s840_s5, 4096  ;;  %p1016_p7 = scmp.lt.s32.totalorder %s840_s5, %s840_s5 }
 0x1d9   :  { %v638_v50 = vpop.f32.mrf.mxu0  ;;  %p1012_p6 = scmp.ne.s32.totalorder %s840_s5, %s1011_s21  ;;  %p1017_p8 = scmp.lt.s32.totalorder %s1011_s21, %s1011_s21 }
 0x1da   :  { %791 = vst [vmem:[#allocation9 + $0x8] sm:$0xff] %v637_v49 }
 0x1db   :  { %v641_v51 = vpop.f32.mrf.mxu0  ;;  %p1018_p9 = por %p1017_p8, %p1016_p7 }
 0x1dc   :  { %v642_v52 = vadd.f32 %v1276_v46, %v641_v51 }
 0x1dd   :  { %v643_v53 = vpop.f32.mrf.mxu0  ;;  %p1019_p10 = pnand %p1018_p9, %p1012_p6 }
 0x1de   :  { %792 = vst [vmem:[#allocation9 + $0x10] sm:$0xff] %v642_v52 }
 0x1df   :  { %v646_v54 = vpop.f32.mrf.mxu0 }
 0x1e0   :  { %v647_v55 = vadd.f32 %v1276_v46, %v646_v54 }
 0x1e1   :  { %v648_v56 = vpop.f32.mrf.mxu0 }
 0x1e2   :  { %793 = vst [vmem:[#allocation9 + $0x18] sm:$0xff] %v647_v55 }
 0x1e3   :  { %v651_v57 = vpop.f32.mrf.mxu1 }
 0x1e4   :  { %v652_v58 = vadd.f32 %v1276_v46, %v651_v57 }
 0x1e5   :  { %v653_v59 = vpop.f32.mrf.mxu1 }
 0x1e6   :  { %794 = vst [vmem:[#allocation9 + $0x20] sm:$0xff] %v652_v58 }
 0x1e7   :  { %v656_v60 = vpop.f32.mrf.mxu1 }
 0x1e8   :  { %v657_v61 = vadd.f32 %v1276_v46, %v656_v60 }
 0x1e9   :  { %v658_v62 = vpop.f32.mrf.mxu1 }
 0x1ea   :  { %795 = vst [vmem:[#allocation9 + $0x28] sm:$0xff] %v657_v61 }
 0x1eb   :  { %v661_v63 = vpop.f32.mrf.mxu1 }
 0x1ec   :  { %v662_v1 = vadd.f32 %v1276_v46, %v661_v63 }
 0x1ed   :  { %v663_v2 = vpop.f32.mrf.mxu1 }
 0x1ee   :  { %796 = vst [vmem:[#allocation9 + $0x30] sm:$0xff] %v662_v1 }
 0x1ef   :  { %v666_v3 = vpop.f32.mrf.mxu1 }
 0x1f0   :  { %v667_v4 = vadd.f32 %v1276_v46, %v666_v3 }
 0x1f1   :  { %v668_v5 = vpop.f32.mrf.mxu1 }
 0x1f2   :  { %797 = vst [vmem:[#allocation9 + $0x38] sm:$0xff] %v667_v4 }
 0x1f3   :  { %v671_v6 = vpop.f32.mrf.mxu1 }
 0x1f4   :  { %v672_v7 = vadd.f32 %v1276_v46, %v671_v6 }
 0x1f5   :  { %v673_v8 = vpop.f32.mrf.mxu1 }
 0x1f6   :  { %798 = vst [vmem:[#allocation9 + $0x40] sm:$0xff] %v672_v7 }
 0x1f7   :  { %v676_v9 = vpop.f32.mrf.mxu1 }
 0x1f8   :  { %v677_v10 = vadd.f32 %v1276_v46, %v676_v9 }
 0x1f9   :  { %v678_v11 = vpop.f32.mrf.mxu1 }
 0x1fa   :  { %799 = vst [vmem:[#allocation9 + $0x48] sm:$0xff] %v677_v10 }
 0x1fb   :  { %v681_v12 = vpop.f32.mrf.mxu1 }
 0x1fc   :  { %v682_v13 = vadd.f32 %v1276_v46, %v681_v12 }
 0x1fd   :  { %v683_v14 = vpop.f32.mrf.mxu1 }
 0x1fe   :  { %800 = vst [vmem:[#allocation9 + $0x50] sm:$0xff] %v682_v13 }
 0x1ff   :  { %v686_v15 = vpop.f32.mrf.mxu1 }
 0x200   :  { %v687_v16 = vadd.f32 %v1276_v46, %v686_v15 }
 0x201   :  { %v688_v17 = vpop.f32.mrf.mxu1 }
 0x202   :  { %801 = vst [vmem:[#allocation9 + $0x58] sm:$0xff] %v687_v16 }
 0x203   :  { %v691_v18 = vpop.f32.mrf.mxu1 }
 0x204   :  { %v692_v19 = vadd.f32 %v1276_v46, %v691_v18 }
 0x205   :  { %v693_v20 = vpop.f32.mrf.mxu1 }
 0x206   :  { %802 = vst [vmem:[#allocation9 + $0x60] sm:$0xff] %v692_v19 }
 0x207   :  { %v696_v21 = vpop.f32.mrf.mxu1 }
 0x208   :  { %v697_v22 = vadd.f32 %v1276_v46, %v696_v21 }
 0x209   :  { %v698_v23 = vpop.f32.mrf.mxu1 }
 0x20a   :  { %803 = vst [vmem:[#allocation9 + $0x68] sm:$0xff] %v697_v22 }
 0x20b   :  { %v701_v24 = vpop.f32.mrf.mxu1 }
 0x20c   :  { %v702_v25 = vadd.f32 %v1276_v46, %v701_v24 }
 0x20d   :  { %v703_v26 = vpop.f32.mrf.mxu1 }
 0x20e   :  { %804 = vst [vmem:[#allocation9 + $0x70] sm:$0xff] %v702_v25 }
 0x20f   :  { %v706_v27 = vpop.f32.mrf.mxu1 }
 0x210   :  { %v707_v28 = vadd.f32 %v1276_v46, %v706_v27 }
 0x211   :  { %v708_v29 = vpop.f32.mrf.mxu1 }
 0x212   :  { %805 = vst [vmem:[#allocation9 + $0x78] sm:$0xff] %v707_v28 }
 0x213   :  { %v711_v30 = vpop.f32.mrf.mxu1 }
 0x214   :  { %v712_v31 = vadd.f32 %v1276_v46, %v711_v30 }
 0x215   :  { %v713_v32 = vpop.f32.mrf.mxu1 }
 0x216   :  { %806 = vst [vmem:[#allocation9 + $0x80] sm:$0xff] %v712_v31 }
 0x217   :  { %v716_v33 = vpop.f32.mrf.mxu1 }
 0x218   :  { %v717_v34 = vadd.f32 %v1276_v46, %v716_v33 }
 0x219   :  { %v718_v35 = vpop.f32.mrf.mxu1 }
 0x21a   :  { %807 = vst [vmem:[#allocation9 + $0x88] sm:$0xff] %v717_v34 }
 0x21b   :  { %v721_v36 = vpop.f32.mrf.mxu1 }
 0x21c   :  { %v722_v37 = vadd.f32 %v1276_v46, %v721_v36 }
 0x21d   :  { %v723_v38 = vpop.f32.mrf.mxu1 }
 0x21e   :  { %808 = vst [vmem:[#allocation9 + $0x90] sm:$0xff] %v722_v37 }
 0x21f   :  { %v726_v41 = vpop.f32.mrf.mxu1 }
 0x220   :  { %v727_v42 = vadd.f32 %v1276_v46, %v726_v41 }
 0x221   :  { %v728_v43 = vpop.f32.mrf.mxu1 }
 0x222   :  { %809 = vst [vmem:[#allocation9 + $0x98] sm:$0xff] %v727_v42 }
 0x223   :  { %v731_v44 = vpop.f32.mrf.mxu1 }
 0x224   :  { %v732_v0 = vadd.f32 %v1276_v46, %v731_v44 }
 0x225   :  { %v733_v45 = vpop.f32.mrf.mxu1 }
 0x226   :  { %810 = vst [vmem:[#allocation9 + $0xa0] sm:$0xff] %v732_v0 }
 0x227   :  { %v736_v39 = vpop.f32.mrf.mxu1 }
 0x228   :  { %v737_v40 = vadd.f32 %v1276_v46, %v736_v39 }
 0x229   :  { %v738_v47 = vpop.f32.mrf.mxu1 }
 0x22a   :  { %811 = vst [vmem:[#allocation9 + $0xa8] sm:$0xff] %v737_v40 }
 0x22b   :  { %v741_v48 = vpop.f32.mrf.mxu1 }
 0x22c   :  { %v742_v49 = vadd.f32 %v1276_v46, %v741_v48 }
 0x22d   :  { %v743_v50 = vpop.f32.mrf.mxu1 }
 0x22e   :  { %812 = vst [vmem:[#allocation9 + $0xb0] sm:$0xff] %v742_v49 }
 0x22f   :  { %v746_v51 = vpop.f32.mrf.mxu1 }
 0x230   :  { %v747_v52 = vadd.f32 %v1276_v46, %v746_v51 }
 0x231   :  { %v748_v53 = vpop.f32.mrf.mxu1 }
 0x232   :  { %813 = vst [vmem:[#allocation9 + $0xb8] sm:$0xff] %v747_v52 }
 0x233   :  { %v751_v54 = vpop.f32.mrf.mxu1 }
 0x234   :  { %v752_v55 = vadd.f32 %v1276_v46, %v751_v54 }
 0x235   :  { %v753_v56 = vpop.f32.mrf.mxu1 }
 0x236   :  { %814 = vst [vmem:[#allocation9 + $0xc0] sm:$0xff] %v752_v55 }
 0x237   :  { %v756_v57 = vpop.f32.mrf.mxu1 }
 0x238   :  { %v757_v58 = vadd.f32 %v1276_v46, %v756_v57 }
 0x239   :  { %v758_v59 = vpop.f32.mrf.mxu1 }
 0x23a   :  { %815 = vst [vmem:[#allocation9 + $0xc8] sm:$0xff] %v757_v58 }
 0x23b   :  { %v761_v60 = vpop.f32.mrf.mxu1 }
 0x23c   :  { %v762_v61 = vadd.f32 %v1276_v46, %v761_v60 }
 0x23d   :  { %v763_v62 = vpop.f32.mrf.mxu1 }
 0x23e   :  { %816 = vst [vmem:[#allocation9 + $0xd0] sm:$0xff] %v762_v61 }
 0x23f   :  { %v766_v63 = vpop.f32.mrf.mxu1 }
 0x240   :  { %v767_v1 = vadd.f32 %v1276_v46, %v766_v63 }
 0x241   :  { %v768_v2 = vpop.f32.mrf.mxu1 }
 0x242   :  { %817 = vst [vmem:[#allocation9 + $0xd8] sm:$0xff] %v767_v1 }
 0x243   :  { %v771_v3 = vpop.f32.mrf.mxu1 }
 0x244   :  { %v772_v4 = vadd.f32 %v1276_v46, %v771_v3 }
 0x245   :  { %v773_v5 = vpop.f32.mrf.mxu1 }
 0x246   :  { %818 = vst [vmem:[#allocation9 + $0xe0] sm:$0xff] %v772_v4 }
 0x247   :  { %v776_v6 = vpop.f32.mrf.mxu1 }
 0x248   :  { %v777_v7 = vadd.f32 %v1276_v46, %v776_v6 }
 0x249   :  { %v778_v8 = vpop.f32.mrf.mxu1 }
 0x24a   :  { %819 = vst [vmem:[#allocation9 + $0xe8] sm:$0xff] %v777_v7 }
 0x24b   :  { %v781_v9 = vpop.f32.mrf.mxu1 }
 0x24c   :  { %v782_v10 = vadd.f32 %v1276_v46, %v781_v9 }
 0x24d   :  { %v783_v11 = vpop.f32.mrf.mxu1 }
 0x24e   :  { %820 = vst [vmem:[#allocation9 + $0xf0] sm:$0xff] %v782_v10 }
 0x24f   :  { %v786_v12 = vpop.f32.mrf.mxu1 }
 0x250   :  { %v787_v13 = vadd.f32 %v1276_v46, %v786_v12 }
 0x251   :  { %v788_v14 = vpop.f32.mrf.mxu1 }
 0x252   :  { %821 = vst [vmem:[#allocation9 + $0xf8] sm:$0xff] %v787_v13 }
 0x253   :  { %1022 = shalt.err (!%p1019_p10)
}
 0x254   :  { %845 = dma.vmem_to_hbm [thread:$0]  %s840_s5, 4096, %s1328_s6, [#allocation10], %s1043_s7, %s1043_s7, %s1044_s8  }
 0x255   :  { %1035 = dma.done.wait [#allocation4], 8192  }
 0x256   :  { %1036 = vsyncadd [#allocation4], 4294959104 }
 0x257   :  { %1037 = dma.done.wait [#allocation10], 4096  }
 0x258   :  { %1038 = vsyncadd [#allocation10], 4294963200 }
 0x259   :  { %852 = vsyncpa [#allocation3], 1 }
 0x25a   :  { %853 = vsyncpa [#allocation6], 1 }
 0x25b   :  { %854 = vsyncpa [#allocation4], 1 }
 0x25c   :  { %855 = vsyncpa [#allocation10], 1 }

</bundles_post_ra>
